<compile_context>
chip_gen: v5e
topology: v5e:2x2
jax: 0.10.0
libtpu: 0.0.40
codegen_flags: <defaults>
</compile_context>

<pallas_src>
import jax
import jax.numpy as jnp
from jax.experimental import pallas as pl
from jax.experimental.pallas import tpu as pltpu

VARIANCE = (0.1, 0.2)  # cfg['variance'] in the reference SSD config
_VMEM_LIMIT = 32 * 1024 * 1024  # safe on v5e/v6e/v7x


def _round_up(x, m):
    return ((x + m - 1) // m) * m


# ----------------------------------------------------------------------------
# Pallas kernels
# ----------------------------------------------------------------------------
def _jaccard_kernel(t_ref, p_ref, out_ref):
    # t_ref: [T, 4] truths in point form (one batch sample)
    # p_ref: [4, P] priors in point form, transposed so lanes carry priors
    t = t_ref[...]
    p = p_ref[...]
    ax1, ay1, ax2, ay2 = t[:, 0:1], t[:, 1:2], t[:, 2:3], t[:, 3:4]   # [T,1]
    bx1, by1, bx2, by2 = p[0:1, :], p[1:2, :], p[2:3, :], p[3:4, :]   # [1,P]
    iw = jnp.maximum(jnp.minimum(ax2, bx2) - jnp.maximum(ax1, bx1), 0.0)
    ih = jnp.maximum(jnp.minimum(ay2, by2) - jnp.maximum(ay1, by1), 0.0)
    inter = iw * ih                                                   # [T,P]
    area_a = (ax2 - ax1) * (ay2 - ay1)                                # [T,1]
    area_b = (bx2 - bx1) * (by2 - by1)                                # [1,P]
    union = area_a + area_b - inter
    # divide on the otherwise-idle EUP
    out_ref[...] = inter * pl.reciprocal(union, approx=True)


def jaccard_batched(truths_b, priors_point):
    # truths_b: [B, T, 4] point form ; priors_point: [P, 4] point form
    B, T, _ = truths_b.shape
    P = priors_point.shape[0]
    return pl.pallas_call(
        _jaccard_kernel,
        out_shape=jax.ShapeDtypeStruct((B, T, P), jnp.float32),
        grid=(B,),
        in_specs=[pl.BlockSpec((None, T, 4), lambda b: (b, 0, 0)),
                  pl.BlockSpec((4, P), lambda b: (0, 0))],
        out_specs=pl.BlockSpec((None, T, P), lambda b: (b, 0, 0)),
        compiler_params=pltpu.CompilerParams(
            dimension_semantics=("parallel",),
            vmem_limit_bytes=_VMEM_LIMIT),
    )(truths_b.astype(jnp.float32), priors_point.T.astype(jnp.float32))


def _conf_ce_kernel(conf_ref, tgt_ref, out_ref):
    # conf_ref: [C, TR] f32  (classes on sublanes, rows on lanes)
    # tgt_ref : [1, TR] i32  matched class index per row
    # out_ref : [1, TR] f32  per-row softmax cross entropy = LSE(x) - x[t]
    x = conf_ref[...]
    t = tgt_ref[...]
    cls = jax.lax.broadcasted_iota(jnp.int32, x.shape, 0)      # class id / sublane
    onehot = (cls == t).astype(x.dtype)                        # [C, TR]
    gathered = jnp.sum(x * onehot, axis=0, keepdims=True)      # [1, TR]
    rmax = jnp.max(x, axis=0, keepdims=True)                   # [1, TR]
    lse = jnp.log(jnp.sum(jnp.exp(x - rmax), axis=0, keepdims=True)) + rmax
    out_ref[...] = lse - gathered


def conf_row_losses(batch_conf, tgt, *, tile_rows=4096):
    # batch_conf: [R, C] f32 ; tgt: [R] int32  ->  [R] per-row CE loss
    R, C = batch_conf.shape
    tr = min(tile_rows, _round_up(R, 128))
    R_pad = _round_up(R, tr)
    conf_T = jnp.pad(batch_conf.astype(jnp.float32),
                     ((0, R_pad - R), (0, 0))).T               # [C, R_pad]
    tgt2 = jnp.pad(tgt.astype(jnp.int32), (0, R_pad - R)).reshape(1, R_pad)
    out = pl.pallas_call(
        _conf_ce_kernel,
        out_shape=jax.ShapeDtypeStruct((1, R_pad), jnp.float32),
        grid=(R_pad // tr,),
        in_specs=[pl.BlockSpec((C, tr), lambda i: (0, i)),
                  pl.BlockSpec((1, tr), lambda i: (0, i))],
        out_specs=pl.BlockSpec((1, tr), lambda i: (0, i)),
        compiler_params=pltpu.CompilerParams(
            dimension_semantics=("parallel",),
            vmem_limit_bytes=_VMEM_LIMIT),
    )(conf_T, tgt2)
    return out[0, :R]


def _smooth_l1_kernel(p_ref, t_ref, m_ref, out_ref):
    # p_ref/t_ref/m_ref: [TS, 128] f32 lane-dense slabs ; out_ref: [1, 128] acc
    @pl.when(pl.program_id(0) == 0)
    def _init():
        out_ref[...] = jnp.zeros_like(out_ref)

    d = p_ref[...] - t_ref[...]
    ad = jnp.abs(d)
    per = jnp.where(ad < 1.0, 0.5 * d * d, ad - 0.5)   # beta = 1 (torch default)
    out_ref[...] += jnp.sum(per * m_ref[...], axis=0, keepdims=True)


def smooth_l1_masked_sum(p_flat, t_flat, m_flat, *, tile_sublanes=512):
    # flat f32 vectors of equal length; returns scalar sum of masked smooth-L1
    L = p_flat.shape[0]
    n_sub = pl.cdiv(L, 128)
    ts = min(tile_sublanes, _round_up(n_sub, 8))
    n_sub_pad = _round_up(n_sub, ts)
    L_pad = n_sub_pad * 128

    def pack(x):
        return jnp.pad(x.astype(jnp.float32), (0, L_pad - L)).reshape(n_sub_pad, 128)

    partial = pl.pallas_call(
        _smooth_l1_kernel,
        out_shape=jax.ShapeDtypeStruct((1, 128), jnp.float32),
        grid=(n_sub_pad // ts,),
        in_specs=[pl.BlockSpec((ts, 128), lambda i: (i, 0)),
                  pl.BlockSpec((ts, 128), lambda i: (i, 0)),
                  pl.BlockSpec((ts, 128), lambda i: (i, 0))],
        out_specs=pl.BlockSpec((1, 128), lambda i: (0, 0)),
        compiler_params=pltpu.CompilerParams(
            dimension_semantics=("arbitrary",),
            vmem_limit_bytes=_VMEM_LIMIT),
    )(pack(p_flat), pack(t_flat), pack(m_flat))
    return jnp.sum(partial)


# ----------------------------------------------------------------------------
# Glue (plain JAX): matching / encoding / hard negative mining bookkeeping
# ----------------------------------------------------------------------------
def point_form(boxes):
    return jnp.concatenate([boxes[:, :2] - boxes[:, 2:] / 2,
                            boxes[:, :2] + boxes[:, 2:] / 2], axis=1)


def encode_batch(matched, priors, variances):
    # matched: [B, P, 4] point form ; priors: [P, 4] center-size
    pr = priors[None]
    g_cxcy = (matched[..., :2] + matched[..., 2:]) / 2 - pr[..., :2]
    g_cxcy = g_cxcy / (variances[0] * pr[..., 2:])
    g_wh = (matched[..., 2:] - matched[..., :2]) / pr[..., 2:]
    g_wh = jnp.log(g_wh) / variances[1]
    return jnp.concatenate([g_cxcy, g_wh], axis=-1)


def match_batch(threshold, truths_b, priors, variances, labels_b):
    # truths_b: [B, T, 4], labels_b: [B, T], priors: [P, 4] center-size
    B, T, _ = truths_b.shape
    overlaps = jaccard_batched(truths_b, point_form(priors))   # [B, T, P] (Pallas)
    best_prior_idx = jnp.argmax(overlaps, axis=2)              # [B, T]
    best_truth_overlap = jnp.max(overlaps, axis=1)             # [B, P]
    best_truth_idx = jnp.argmax(overlaps, axis=1)              # [B, P]
    b_idx = jnp.arange(B)[:, None]
    best_truth_overlap = best_truth_overlap.at[b_idx, best_prior_idx].set(2.0)
    for j in range(T):  # small static loop; later j wins on collisions (as ref)
        best_truth_idx = best_truth_idx.at[jnp.arange(B),
                                           best_prior_idx[:, j]].set(j)
    matches = jnp.take_along_axis(truths_b, best_truth_idx[:, :, None], axis=1)
    conf = jnp.take_along_axis(labels_b, best_truth_idx, axis=1) + 1.0
    conf = jnp.where(best_truth_overlap < threshold, 0.0, conf)
    loc = encode_batch(matches, priors, variances)
    return loc, conf.astype(jnp.int32)


class MultiBoxLoss:
    def __init__(self, num_classes, overlap_thresh, prior_for_matching, bkg_label,
                 neg_mining, neg_pos, neg_overlap, encode_target, use_gpu=True):
        self.use_gpu = use_gpu
        self.num_classes = num_classes
        self.threshold = overlap_thresh
        self.background_label = bkg_label
        self.encode_target = encode_target
        self.use_prior_for_matching = prior_for_matching
        self.do_neg_mining = neg_mining
        self.negpos_ratio = neg_pos
        self.neg_overlap = neg_overlap
        self.variance = VARIANCE

    def __call__(self, predictions, targets):
        loc_data, conf_data, priors = predictions
        num = loc_data.shape[0]
        priors = priors[:loc_data.shape[1], :].astype(jnp.float32)
        num_priors = priors.shape[0]
        num_classes = self.num_classes

        targets = jnp.asarray(targets)
        truths_b = targets[:, :, :4].astype(jnp.float32)       # [B, T, 4]
        labels_b = targets[:, :, 4].astype(jnp.float32)        # [B, T]

        loc_t, conf_t = match_batch(self.threshold, truths_b, priors,
                                    self.variance, labels_b)   # [B,P,4], [B,P]
        pos = conf_t > 0                                        # [B, P]

        # ----- localization loss: masked Smooth-L1 sum (Pallas, lane-dense) -----
        mask4 = jnp.broadcast_to(pos[..., None], loc_data.shape).astype(jnp.float32)
        loss_l = smooth_l1_masked_sum(
            loc_data.astype(jnp.float32).reshape(-1),
            loc_t.reshape(-1),
            mask4.reshape(-1))

        # ----- per-row confidence CE (Pallas). The reference's global-max
        # "log_sum_exp hack" equals the row-max-stabilized LSE, so one kernel
        # output serves both the mining ranking and the final CE sum. -----
        batch_conf = conf_data.reshape(-1, num_classes).astype(jnp.float32)
        ce_rows = conf_row_losses(batch_conf, conf_t.reshape(-1))
        ce_rows = ce_rows.reshape(num, num_priors)

        loss_c_mine = jnp.where(pos, 0.0, ce_rows)

        # ----- hard negative mining: one descending sort + inverse-perm scatter
        # TODO(synk): sorting has no Pallas TPU primitive; argsort stays in XLA.
        loss_idx = jnp.argsort(-loss_c_mine, axis=1)            # [B, P]
        ranks = jnp.broadcast_to(jnp.arange(num_priors, dtype=jnp.int32)[None, :],
                                 (num, num_priors))
        idx_rank = jnp.zeros((num, num_priors), jnp.int32).at[
            jnp.arange(num)[:, None], loss_idx].set(ranks)
        num_pos = pos.astype(jnp.int32).sum(axis=1, keepdims=True)
        num_neg = jnp.minimum(self.negpos_ratio * num_pos, num_priors - 1)
        neg = idx_rank < num_neg

        sel = jnp.logical_or(pos, neg)
        loss_c = jnp.sum(jnp.where(sel, ce_rows, 0.0))

        # TPU has no native f64; keep the final normalization in f32
        # (the reference's .double() is only a dtype cast of the same value).
        N = num_pos.sum().astype(jnp.float32)
        return loss_l / N, loss_c / N


# ----------------------------------------------------------------------------
if __name__ == "__main__":
    key = jax.random.PRNGKey(0)
    batch, num_priors, num_classes, num_objs = 2, 128, 8, 3
    k1, k2, k3, k4, k5 = jax.random.split(key, 5)

    loc_data = 0.1 * jax.random.normal(k1, (batch, num_priors, 4), dtype=jnp.float32)
    conf_data = jax.random.normal(k2, (batch, num_priors, num_classes), dtype=jnp.float32)

    # priors in center-size form, all within [0, 1]
    pcxcy = jax.random.uniform(k3, (num_priors, 2), minval=0.1, maxval=0.9,
                               dtype=jnp.float32)
    pwh = jax.random.uniform(k4, (num_priors, 2), minval=0.1, maxval=0.4,
                             dtype=jnp.float32)
    priors = jnp.concatenate([pcxcy, pwh], axis=1)

    # targets: valid point-form ground-truth boxes + integer label (as float)
    tk1, tk2, tk3 = jax.random.split(k5, 3)
    tcxcy = jax.random.uniform(tk1, (batch, num_objs, 2), minval=0.25, maxval=0.75,
                               dtype=jnp.float32)
    twh = jax.random.uniform(tk2, (batch, num_objs, 2), minval=0.1, maxval=0.3,
                             dtype=jnp.float32)
    tmin = tcxcy - twh / 2
    tmax = tcxcy + twh / 2
    tlabels = jax.random.randint(tk3, (batch, num_objs, 1), 0,
                                 num_classes - 1).astype(jnp.float32)
    targets = jnp.concatenate([tmin, tmax, tlabels], axis=2)

    criterion = MultiBoxLoss(num_classes=num_classes, overlap_thresh=0.5,
                             prior_for_matching=True, bkg_label=0,
                             neg_mining=True, neg_pos=3, neg_overlap=0.5,
                             encode_target=False)

    # Single jitted program: fuses the XLA glue (matching, sort-based mining)
    # around the three Pallas kernels instead of op-by-op dispatch.
    loss_fn = jax.jit(
        lambda loc, conf, pri, tgt: criterion((loc, conf, pri), tgt))

    loss_l, loss_c = loss_fn(loc_data, conf_data, priors, targets)
    jax.block_until_ready((loss_l, loss_c))
    assert loss_l.dtype == jnp.float32 and loss_c.dtype == jnp.float32
    assert jnp.isfinite(loss_l) and jnp.isfinite(loss_c)
    print("KERNEL_OK")
</pallas_src>

<mosaic_0001>
module attributes {stable_mosaic.version = 11 : i64} {
  func.func @_conf_ce_kernel(%arg0: i32, %arg1: memref<8x256xf32, #tpu.memory_space<vmem>>, %arg2: memref<1x256xi32, #tpu.memory_space<vmem>>, %arg3: memref<1x256xf32, #tpu.memory_space<vmem>>) attributes {dimension_semantics = [#tpu.dimension_semantics<parallel>], iteration_bounds = array<i64: 1>, scalar_prefetch = 0 : i64, scratch_operands = 0 : i64, tpu.core_type = #tpu.core_type<tc>, window_params = [{transform_indices = @transform_0, window_bounds = array<i64: 8, 256>}, {transform_indices = @transform_1, window_bounds = array<i64: 1, 256>}, {transform_indices = @transform_2, window_bounds = array<i64: 1, 256>}]} {
    %c0 = arith.constant 0 : index
    %c0_0 = arith.constant 0 : index
    %0 = vector.load %arg1[%c0, %c0_0] : memref<8x256xf32, #tpu.memory_space<vmem>>, vector<8x256xf32>
    %c0_1 = arith.constant 0 : index
    %c0_2 = arith.constant 0 : index
    %1 = vector.load %arg2[%c0_1, %c0_2] : memref<1x256xi32, #tpu.memory_space<vmem>>, vector<1x256xi32>
    %2 = tpu.iota {dimensions = array<i32: 0>} : vector<8x256xi32>
    %3 = vector.broadcast %1 : vector<1x256xi32> to vector<8x256xi32>
    %4 = arith.cmpi eq, %2, %3 : vector<8x256xi32>
    %5 = arith.extui %4 : vector<8x256xi1> to vector<8x256xi32>
    %6 = arith.sitofp %5 : vector<8x256xi32> to vector<8x256xf32>
    %7 = arith.mulf %0, %6 : vector<8x256xf32>
    %cst = arith.constant dense<0.000000e+00> : vector<256xf32>
    %8 = vector.multi_reduction <add>, %7, %cst [0] : vector<8x256xf32> to vector<256xf32>
    %9 = vector.shape_cast %8 : vector<256xf32> to vector<1x256xf32>
    %cst_3 = arith.constant dense<0xFF800000> : vector<256xf32>
    %10 = vector.multi_reduction <maximumf>, %0, %cst_3 [0] : vector<8x256xf32> to vector<256xf32>
    %11 = vector.shape_cast %10 : vector<256xf32> to vector<1x256xf32>
    %12 = vector.broadcast %11 : vector<1x256xf32> to vector<8x256xf32>
    %13 = arith.subf %0, %12 : vector<8x256xf32>
    %14 = math.exp %13 : vector<8x256xf32>
    %cst_4 = arith.constant dense<0.000000e+00> : vector<256xf32>
    %15 = vector.multi_reduction <add>, %14, %cst_4 [0] : vector<8x256xf32> to vector<256xf32>
    %16 = vector.shape_cast %15 : vector<256xf32> to vector<1x256xf32>
    %17 = math.log %16 : vector<1x256xf32>
    %18 = arith.addf %17, %11 : vector<1x256xf32>
    %19 = arith.subf %18, %9 : vector<1x256xf32>
    %c0_5 = arith.constant 0 : index
    %c0_6 = arith.constant 0 : index
    %20 = vector.load %arg3[%c0_5, %c0_6] : memref<1x256xf32, #tpu.memory_space<vmem>>, vector<1x256xf32>
    tpu.vector_store %arg3[%c0_5, %c0_6], %19 {strides = array<i32>} : memref<1x256xf32, #tpu.memory_space<vmem>>, vector<1x256xf32>,
    return
  }
  func.func @transform_0(%arg0: i32) -> (i32, i32) {
    %c0_i32 = arith.constant 0 : i32
    %c0_i32_0 = arith.constant 0 : i32
    return %c0_i32, %arg0 : i32, i32
  }
  func.func @transform_1(%arg0: i32) -> (i32, i32) {
    %c0_i32 = arith.constant 0 : i32
    %c0_i32_0 = arith.constant 0 : i32
    return %c0_i32, %arg0 : i32, i32
  }
  func.func @transform_2(%arg0: i32) -> (i32, i32) {
    %c0_i32 = arith.constant 0 : i32
    %c0_i32_0 = arith.constant 0 : i32
    return %c0_i32, %arg0 : i32, i32
  }
}

module attributes {stable_mosaic.version = 11 : i64} {
  func.func @_jaccard_kernel(%arg0: i32, %arg1: memref<1x3x4xf32, #tpu.memory_space<vmem>>, %arg2: memref<4x128xf32, #tpu.memory_space<vmem>>, %arg3: memref<1x3x128xf32, #tpu.memory_space<vmem>>) attributes {dimension_semantics = [#tpu.dimension_semantics<parallel>], iteration_bounds = array<i64: 2>, scalar_prefetch = 0 : i64, scratch_operands = 0 : i64, tpu.core_type = #tpu.core_type<tc>, window_params = [{transform_indices = @transform_0, window_bounds = array<i64: 1, 3, 4>}, {pipeline_mode = #tpu.pipeline_mode<synchronous>, transform_indices = @transform_1, window_bounds = array<i64: 4, 128>}, {transform_indices = @transform_2, window_bounds = array<i64: 1, 3, 128>}]} {
    %c0 = arith.constant 0 : index
    %c0_0 = arith.constant 0 : index
    %c0_1 = arith.constant 0 : index
    %0 = vector.load %arg1[%c0, %c0_0, %c0_1] : memref<1x3x4xf32, #tpu.memory_space<vmem>>, vector<1x3x4xf32>
    %1 = vector.shape_cast %0 : vector<1x3x4xf32> to vector<3x4xf32>
    %c0_2 = arith.constant 0 : index
    %c0_3 = arith.constant 0 : index
    %2 = vector.load %arg2[%c0_2, %c0_3] : memref<4x128xf32, #tpu.memory_space<vmem>>, vector<4x128xf32>
    %3 = vector.extract_strided_slice %1 {offsets = [0, 0], sizes = [3, 1], strides = [1, 1]} : vector<3x4xf32> to vector<3x1xf32>
    %4 = vector.extract_strided_slice %1 {offsets = [0, 1], sizes = [3, 1], strides = [1, 1]} : vector<3x4xf32> to vector<3x1xf32>
    %5 = vector.extract_strided_slice %1 {offsets = [0, 2], sizes = [3, 1], strides = [1, 1]} : vector<3x4xf32> to vector<3x1xf32>
    %6 = vector.extract_strided_slice %1 {offsets = [0, 3], sizes = [3, 1], strides = [1, 1]} : vector<3x4xf32> to vector<3x1xf32>
    %7 = vector.extract_strided_slice %2 {offsets = [0, 0], sizes = [1, 128], strides = [1, 1]} : vector<4x128xf32> to vector<1x128xf32>
    %8 = vector.extract_strided_slice %2 {offsets = [1, 0], sizes = [1, 128], strides = [1, 1]} : vector<4x128xf32> to vector<1x128xf32>
    %9 = vector.extract_strided_slice %2 {offsets = [2, 0], sizes = [1, 128], strides = [1, 1]} : vector<4x128xf32> to vector<1x128xf32>
    %10 = vector.extract_strided_slice %2 {offsets = [3, 0], sizes = [1, 128], strides = [1, 1]} : vector<4x128xf32> to vector<1x128xf32>
    %11 = vector.broadcast %5 : vector<3x1xf32> to vector<3x128xf32>
    %12 = vector.broadcast %9 : vector<1x128xf32> to vector<3x128xf32>
    %13 = arith.minimumf %11, %12 : vector<3x128xf32>
    %14 = vector.broadcast %3 : vector<3x1xf32> to vector<3x128xf32>
    %15 = vector.broadcast %7 : vector<1x128xf32> to vector<3x128xf32>
    %16 = arith.maximumf %14, %15 : vector<3x128xf32>
    %17 = arith.subf %13, %16 : vector<3x128xf32>
    %cst = arith.constant 0.000000e+00 : f32
    %18 = vector.broadcast %cst : f32 to vector<3x128xf32>
    %19 = arith.maximumf %17, %18 : vector<3x128xf32>
    %20 = vector.broadcast %6 : vector<3x1xf32> to vector<3x128xf32>
    %21 = vector.broadcast %10 : vector<1x128xf32> to vector<3x128xf32>
    %22 = arith.minimumf %20, %21 : vector<3x128xf32>
    %23 = vector.broadcast %4 : vector<3x1xf32> to vector<3x128xf32>
    %24 = vector.broadcast %8 : vector<1x128xf32> to vector<3x128xf32>
    %25 = arith.maximumf %23, %24 : vector<3x128xf32>
    %26 = arith.subf %22, %25 : vector<3x128xf32>
    %cst_4 = arith.constant 0.000000e+00 : f32
    %27 = vector.broadcast %cst_4 : f32 to vector<3x128xf32>
    %28 = arith.maximumf %26, %27 : vector<3x128xf32>
    %29 = arith.mulf %19, %28 : vector<3x128xf32>
    %30 = arith.subf %5, %3 : vector<3x1xf32>
    %31 = arith.subf %6, %4 : vector<3x1xf32>
    %32 = arith.mulf %30, %31 : vector<3x1xf32>
    %33 = arith.subf %9, %7 : vector<1x128xf32>
    %34 = arith.subf %10, %8 : vector<1x128xf32>
    %35 = arith.mulf %33, %34 : vector<1x128xf32>
    %36 = vector.broadcast %32 : vector<3x1xf32> to vector<3x128xf32>
    %37 = vector.broadcast %35 : vector<1x128xf32> to vector<3x128xf32>
    %38 = arith.addf %36, %37 : vector<3x128xf32>
    %39 = arith.subf %38, %29 : vector<3x128xf32>
    %40 = tpu.reciprocal %39 {approx = true} : vector<3x128xf32> -> vector<3x128xf32>
    %41 = arith.mulf %29, %40 : vector<3x128xf32>
    %c0_5 = arith.constant 0 : index
    %c0_6 = arith.constant 0 : index
    %c0_7 = arith.constant 0 : index
    %42 = vector.load %arg3[%c0_5, %c0_6, %c0_7] : memref<1x3x128xf32, #tpu.memory_space<vmem>>, vector<1x3x128xf32>
    %43 = vector.shape_cast %42 : vector<1x3x128xf32> to vector<3x128xf32>
    %44 = vector.shape_cast %41 : vector<3x128xf32> to vector<1x3x128xf32>
    tpu.vector_store %arg3[%c0_5, %c0_6, %c0_7], %44 {strides = array<i32>} : memref<1x3x128xf32, #tpu.memory_space<vmem>>, vector<1x3x128xf32>,
    return
  }
  func.func @transform_0(%arg0: i32) -> (i32, i32, i32) {
    %c0_i32 = arith.constant 0 : i32
    %c0_i32_0 = arith.constant 0 : i32
    %c0_i32_1 = arith.constant 0 : i32
    return %arg0, %c0_i32, %c0_i32_0 : i32, i32, i32
  }
  func.func @transform_1(%arg0: i32) -> (i32, i32) {
    %c0_i32 = arith.constant 0 : i32
    %c0_i32_0 = arith.constant 0 : i32
    %c0_i32_1 = arith.constant 0 : i32
    return %c0_i32, %c0_i32_0 : i32, i32
  }
  func.func @transform_2(%arg0: i32) -> (i32, i32, i32) {
    %c0_i32 = arith.constant 0 : i32
    %c0_i32_0 = arith.constant 0 : i32
    %c0_i32_1 = arith.constant 0 : i32
    return %arg0, %c0_i32, %c0_i32_0 : i32, i32, i32
  }
}

module attributes {stable_mosaic.version = 11 : i64} {
  func.func @_smooth_l1_kernel(%arg0: i32, %arg1: memref<8x128xf32, #tpu.memory_space<vmem>>, %arg2: memref<8x128xf32, #tpu.memory_space<vmem>>, %arg3: memref<8x128xf32, #tpu.memory_space<vmem>>, %arg4: memref<1x128xf32, #tpu.memory_space<vmem>>) attributes {dimension_semantics = [#tpu.dimension_semantics<arbitrary>], iteration_bounds = array<i64: 1>, scalar_prefetch = 0 : i64, scratch_operands = 0 : i64, tpu.core_type = #tpu.core_type<tc>, window_params = [{transform_indices = @transform_0, window_bounds = array<i64: 8, 128>}, {transform_indices = @transform_1, window_bounds = array<i64: 8, 128>}, {transform_indices = @transform_2, window_bounds = array<i64: 8, 128>}, {pipeline_mode = #tpu.pipeline_mode<synchronous>, transform_indices = @transform_3, window_bounds = array<i64: 1, 128>}]} {
    %c0_i32 = arith.constant 0 : i32
    %0 = arith.cmpi eq, %arg0, %c0_i32 : i32
    %1 = arith.extui %0 : i1 to i32
    %c0_i32_0 = arith.constant 0 : i32
    %2 = arith.cmpi ne, %1, %c0_i32_0 : i32
    scf.if %2 {
      %cst_13 = arith.constant 0.000000e+00 : f32
      %22 = vector.broadcast %cst_13 : f32 to vector<1x128xf32>
      %c0_14 = arith.constant 0 : index
      %c0_15 = arith.constant 0 : index
      %23 = vector.load %arg4[%c0_14, %c0_15] : memref<1x128xf32, #tpu.memory_space<vmem>>, vector<1x128xf32>
      tpu.vector_store %arg4[%c0_14, %c0_15], %22 {strides = array<i32>} : memref<1x128xf32, #tpu.memory_space<vmem>>, vector<1x128xf32>,
    } else {
    }
    %c0 = arith.constant 0 : index
    %c0_1 = arith.constant 0 : index
    %3 = vector.load %arg1[%c0, %c0_1] : memref<8x128xf32, #tpu.memory_space<vmem>>, vector<8x128xf32>
    %c0_2 = arith.constant 0 : index
    %c0_3 = arith.constant 0 : index
    %4 = vector.load %arg2[%c0_2, %c0_3] : memref<8x128xf32, #tpu.memory_space<vmem>>, vector<8x128xf32>
    %5 = arith.subf %3, %4 : vector<8x128xf32>
    %6 = math.absf %5 : vector<8x128xf32>
    %cst = arith.constant 1.000000e+00 : f32
    %7 = vector.broadcast %cst : f32 to vector<8x128xf32>
    %8 = arith.cmpf olt, %6, %7 : vector<8x128xf32>
    %cst_4 = arith.constant 5.000000e-01 : f32
    %9 = vector.broadcast %cst_4 : f32 to vector<8x128xf32>
    %10 = arith.mulf %9, %5 : vector<8x128xf32>
    %11 = arith.mulf %10, %5 : vector<8x128xf32>
    %cst_5 = arith.constant 5.000000e-01 : f32
    %12 = vector.broadcast %cst_5 : f32 to vector<8x128xf32>
    %13 = arith.subf %6, %12 : vector<8x128xf32>
    %14 = arith.select %8, %11, %13 : vector<8x128xi1>, vector<8x128xf32>
    %c0_6 = arith.constant 0 : index
    %c0_7 = arith.constant 0 : index
    %15 = vector.load %arg4[%c0_6, %c0_7] : memref<1x128xf32, #tpu.memory_space<vmem>>, vector<1x128xf32>
    %c0_8 = arith.constant 0 : index
    %c0_9 = arith.constant 0 : index
    %16 = vector.load %arg3[%c0_8, %c0_9] : memref<8x128xf32, #tpu.memory_space<vmem>>, vector<8x128xf32>
    %17 = arith.mulf %14, %16 : vector<8x128xf32>
    %cst_10 = arith.constant dense<0.000000e+00> : vector<128xf32>
    %18 = vector.multi_reduction <add>, %17, %cst_10 [0] : vector<8x128xf32> to vector<128xf32>
    %19 = vector.shape_cast %18 : vector<128xf32> to vector<1x128xf32>
    %20 = arith.addf %15, %19 : vector<1x128xf32>
    %c0_11 = arith.constant 0 : index
    %c0_12 = arith.constant 0 : index
    %21 = vector.load %arg4[%c0_11, %c0_12] : memref<1x128xf32, #tpu.memory_space<vmem>>, vector<1x128xf32>
    tpu.vector_store %arg4[%c0_11, %c0_12], %20 {strides = array<i32>} : memref<1x128xf32, #tpu.memory_space<vmem>>, vector<1x128xf32>,
    return
  }
  func.func @transform_0(%arg0: i32) -> (i32, i32) {
    %c0_i32 = arith.constant 0 : i32
    %c0_i32_0 = arith.constant 0 : i32
    return %arg0, %c0_i32 : i32, i32
  }
  func.func @transform_1(%arg0: i32) -> (i32, i32) {
    %c0_i32 = arith.constant 0 : i32
    %c0_i32_0 = arith.constant 0 : i32
    return %arg0, %c0_i32 : i32, i32
  }
  func.func @transform_2(%arg0: i32) -> (i32, i32) {
    %c0_i32 = arith.constant 0 : i32
    %c0_i32_0 = arith.constant 0 : i32
    return %arg0, %c0_i32 : i32, i32
  }
  func.func @transform_3(%arg0: i32) -> (i32, i32) {
    %c0_i32 = arith.constant 0 : i32
    %c0_i32_0 = arith.constant 0 : i32
    %c0_i32_1 = arith.constant 0 : i32
    return %c0_i32, %c0_i32_0 : i32, i32
  }
}

</mosaic_0001>

<bundles_post_ra>
// kernel: _lambda_.5
= control target key start
LH: loop header
LB: loop body
LE: loop exit
PB: predicated region body
PF: predicated region fallthrough
CT: control target
= control target key end

     0   :  { %v14_v7 = vlaneseq  ;;  %v102_v23 = vmov 0.0   ;;  %vm79_vm2 = vcmask 1040384   ;;  %s132_s0 = inlined_call_operand.vmem [shape: f32[8,256], index: 0, kind: input, shape index: {}]   ;;  %s133_s1 = inlined_call_operand.vmem [shape: s32[1,256], index: 1, kind: input, shape index: {}]   ;;  %s134_s2 = inlined_call_operand.vmem [shape: f32[1,256], index: 2, kind: output, shape index: {}]  }
   0x1   :  { %v11_v0 = vld [vmem:[%s132_s0] sm:$0xff]  ;;  %v12_v1 = vld [vmem:[%s132_s0 + $0x8] sm:$0xff] }
   0x2   :  { %v38_v2 = vrot.slane %v11_v0, 4  ;;  %v44_v3 = vrot.slane %v12_v1, 4  ;;  %v13_v9 = vld [vmem:[%s133_s1] sm:$0x3]  ;;  %v15_v13 = vshrl.u32 %v14_v7, 7  ;;  %vm84_vm3 = vcmp.lt.s32.totalorder %v14_v7, 256 }
   0x3   :  { %v16_v14 = vperm.slane %v13_v9, 0  ;;  %v17_v15 = vperm.slane %v13_v9, 1 }
   0x4   :  { %v39_v4 = vmax.f32 %v11_v0, %v38_v2  ;;  %v45_v5 = vmax.f32 %v12_v1, %v44_v3 }
   0x5   :  { %vm18_vm0 = vcmp.eq.s32.totalorder %v15_v13, %v16_v14  ;;  %vm19_vm1 = vcmp.eq.s32.totalorder %v15_v13, %v17_v15 }
   0x6   :  { %v40_v6 = vrot.slane %v39_v4, 2  ;;  %v46_v8 = vrot.slane %v45_v5, 2  ;;  %v91_v24 = vsel %vm18_vm0, 1.0, %v102_v23  ;;  %v92_v25 = vsel %vm19_vm1, 1.0, %v102_v23 }
   0x7   :  { %v24_v26 = vmul.f32 %v91_v24, %v11_v0  ;;  %v25_v27 = vmul.f32 %v92_v25, %v12_v1 }
   0x8   :  { %v41_v10 = vmax.f32 %v39_v4, %v40_v6  ;;  %v47_v11 = vmax.f32 %v45_v5, %v46_v8 }
   0x9   :  { %v26_v30 = vrot.slane %v24_v26, 4  ;;  %v32_v31 = vrot.slane %v25_v27, 4 }
   0xa   :  { %v42_v12 = vrot.slane %v41_v10, 1  ;;  %v48_v16 = vrot.slane %v47_v11, 1 }
   0xb   :  { %v27_v36 = vadd.f32 %v26_v30, %v24_v26  ;;  %v33_v37 = vadd.f32 %v32_v31, %v25_v27 }
   0xc   :  { %v43_v17 = vmax.f32 %v41_v10, %v42_v12  ;;  %v49_v18 = vmax.f32 %v47_v11, %v48_v16 }
   0xd   :  { %v28_v42 = vrot.slane %v27_v36, 2  ;;  %v34_v43 = vrot.slane %v33_v37, 2 }
   0xe   :  { %v50_v19 = vsub.f32 %v11_v0, %v43_v17  ;;  %v51_v20 = vsub.f32 %v12_v1, %v49_v18 }
   0xf   :  { %v29_v48 = vadd.f32 %v28_v42, %v27_v36  ;;  %v35_v49 = vadd.f32 %v34_v43, %v33_v37 }
  0x10   :  { %v52_v21 = vmul.f32 1.442695, %v50_v19  ;;  %v54_v22 = vmul.f32 1.442695, %v51_v20 }
  0x11   :  { %v30_v50 = vrot.slane %v29_v48, 1  ;;  %v36_v51 = vrot.slane %v35_v49, 1 }
  0x12   :  { %94 = vpow2.f32 %v52_v21 }
  0x13   :  { %96 = vpow2.f32 %v54_v22  ;;  %v31_v55 = vadd.f32 %v30_v50, %v29_v48  ;;  %v37_v56 = vadd.f32 %v36_v51, %v35_v49 }
  0x18   :  { %v95_v28 = vpop.eup %94 }
  0x19   :  { %v97_v29 = vpop.eup %96  ;;  %v56_v32 = vrot.slane %v95_v28, 4 }
  0x1a   :  { %v62_v33 = vrot.slane %v97_v29, 4 }
  0x1b   :  { %v57_v34 = vadd.f32 %v95_v28, %v56_v32 }
  0x1c   :  { %v63_v35 = vadd.f32 %v97_v29, %v62_v33 }
  0x1d   :  { %v58_v38 = vrot.slane %v57_v34, 2 }
  0x1e   :  { %v64_v39 = vrot.slane %v63_v35, 2 }
  0x1f   :  { %v59_v40 = vadd.f32 %v58_v38, %v57_v34 }
  0x20   :  { %v65_v41 = vadd.f32 %v64_v39, %v63_v35 }
  0x21   :  { %v60_v44 = vrot.slane %v59_v40, 1 }
  0x22   :  { %v66_v45 = vrot.slane %v65_v41, 1 }
  0x23   :  { %v61_v46 = vadd.f32 %v60_v44, %v59_v40 }
  0x24   :  { %v67_v47 = vadd.f32 %v66_v45, %v65_v41 }
  0x25   :  { %98 = vlog2.f32 %v61_v46 }
  0x26   :  { %100 = vlog2.f32 %v67_v47 }
  0x2b   :  { %v99_v52 = vpop.eup %98 }
  0x2c   :  { %v101_v53 = vpop.eup %100  ;;  %v69_v54 = vmul.f32 0.6931472, %v99_v52 }
  0x2d   :  { %v71_v57 = vmul.f32 0.6931472, %v101_v53 }
  0x2e   :  { %v72_v58 = vadd.f32 %v69_v54, %v43_v17 }
  0x2f   :  { %v73_v59 = vadd.f32 %v71_v57, %v49_v18 }
  0x30   :  { %v74_v60 = vsub.f32 %v72_v58, %v31_v55 }
  0x31   :  { %v75_v61 = vsub.f32 %v73_v59, %v37_v56 }
  0x33   :  { %v78_v62 = vrot.slane %v75_v61, 7 }
  0x35   :  { %v80_v63 = vsel %vm79_vm2, %v74_v60, %v78_v62 }
  0x36   :  { %86 = vst.msk [vmem:[%s134_s2] sm:$0x3] %vm84_vm3, %v80_v63 }

// kernel: _lambda_.3
= control target key start
LH: loop header
LB: loop body
LE: loop exit
PB: predicated region body
PF: predicated region fallthrough
CT: control target
= control target key end

     0   :  { %s311_s9 = smov 0   ;;  %s338_s0 = inlined_call_operand.vmem [shape: f32[2,3,4], index: 0, kind: input, shape index: {}]   ;;  %s339_s1 = inlined_call_operand.vmem [shape: f32[4,128], index: 1, kind: input, shape index: {}]   ;;  %s340_s2 = inlined_call_operand.vmem [shape: f32[2,3,128], index: 2, kind: output, shape index: {}]  }
   0x1 LB: > { %s252_s10 = sadd.s32 4294967295, %s288_s9   ;;  %p256_p0 = scmp.ge.s32.totalorder %s288_s9, 1  ;;  %s288_s9 = sphi %s311_s9, %s12_s9  }
   0x2   : > { %p111_p1 = scmp.lt.s32.totalorder %s288_s9, 3 }
   0x4   : > { %p112_p2 = pnand %p256_p0, %p111_p1 }
   0x5   : > { %p131_p3 = scmp.lt.s32.totalorder (!%p112_p2), %s252_s10, 1  ;;  %s290_s15 = smov (!%p112_p2), 2  }
   0x6   : > { %115 = sbr.rel (%p112_p2) target bundleno = 378 (0x17a), region = 28  ;;  %s293_s16 = smov (!%p112_p2), 127  }
   0xb   : > { %s342_s10 = smov (!%p131_p3, %s252_s10), 1  ;;  %v291_v1 = vmov 2   ;;  %v292_v2 = vmov 0   ;;  %v294_v5 = vmov 3   ;;  %v295_v6 = vmov 1  }
   0xc   : > { %s257_s11 = sshll.u32 %s342_s10, 2  ;;  %275 = vset.pattern.permute.xlu1 %v291_v1  ;;  %279 = vset.pattern.permute.xlu0 %v291_v1  ;;  %v140_v11 = vld [vmem:[%s339_s1] sm:$0xf] }
   0xd   : > { %s134_s14 = scalar_lea.vmem %s338_s0, %s257_s11  ;;  %277 = vset.pattern.permute.xlu2 %v294_v5  ;;  %v181_v12 = vrot.slane %v140_v11, 6  ;;  %v146_v13 = vperm.slane %v140_v11, 2  ;;  %v160_v14 = vperm.slane %v140_v11, 3  ;;  %v166_v15 = vperm.slane %v140_v11, 1  ;;  %s138_s21 = scalar_lea.vmem %s340_s2, %s257_s11 }
   0xe   : > { %v139_v0 = vld [vmem:[%s134_s14] sm:$0x7]  ;;  %v152_v16 = vperm.slane %v140_v11, 0 }
   0xf   : > { %171 = vrot.lane.b32.xlu0 %v139_v0, %s290_s15  ;;  %143 = vperm.xlu1 %275, %v139_v0   ;;  %v183_v17 = vsub.f32 %v140_v11, %v181_v12 }
  0x10   : > { %157 = vperm.xlu2 %277, %v139_v0  }
  0x11   : > { %v185_v24 = vrot.slane %v183_v17, 1 }
  0x13   : > { %v187_v27 = vmul.f32 %v185_v24, %v183_v17 }
  0x15   : > { %v193_v30 = vperm.slane %v187_v27, 2 }
  0x17   : > { %276 = vset.pattern.permute.xlu1 %v292_v2 }
  0x18   : > { %149 = vperm.xlu1 %276, %v139_v0   ;;  %278 = vset.pattern.permute.xlu2 %v295_v6 }
  0x19   : > { %163 = vperm.xlu2 %278, %v139_v0  }
  0x6a   : > { %v158_v9 = vpop.permute.xlu2 %157 }
  0x6b   : > { %v161_v21 = vmin.f32 %v158_v9, %v160_v14 }
  0x73   : > { %v164_v18 = vpop.permute.xlu2 %163 }
  0x74   : > { %v167_v22 = vmax.f32 %v164_v18, %v166_v15 }
  0x76   : > { %v168_v25 = vsub.f32 %v161_v21, %v167_v22 }
  0x78   : > { %v169_v28 = vmax.f32 %v168_v25, 0.0 }
  0x81   : > { %v172_v3 = vpop.permute.xlu0 %171  ;;  %v144_v10 = vpop.permute.xlu1 %143 }
  0x82   : > { %v174_v4 = vsub.f32 %v139_v0, %v172_v3  ;;  %v147_v20 = vmin.f32 %v144_v10, %v146_v13 }
  0x84   : > { %176 = vrot.lane.b32.xlu0 %v174_v4, %s293_s16 }
  0x8a   : > { %v150_v19 = vpop.permute.xlu1 %149 }
  0x8b   : > { %v153_v23 = vmax.f32 %v150_v19, %v152_v16 }
  0x8d   : > { %v154_v26 = vsub.f32 %v147_v20, %v153_v23 }
  0x8f   : > { %v155_v29 = vmax.f32 %v154_v26, 0.0 }
  0x91   : > { %v170_v32 = vmul.f32 %v169_v28, %v155_v29 }
  0xf6   : > { %v177_v7 = vpop.permute.xlu0 %176 }
  0xf7   : > { %v179_v8 = vmul.f32 %v177_v7, %v174_v4 }
  0xf9   : > { %190 = vperm.xlu0 %279, %v179_v8  }
 0x16b   : > { %v191_v31 = vpop.permute.xlu0 %190 }
 0x16c   : > { %v194_v33 = vadd.f32 %v193_v30, %v191_v31 }
 0x16e   : > { %v195_v34 = vsub.f32 %v194_v33, %v170_v32 }
 0x170   : > { %280 = vrcp.f32 %v195_v34 }
 0x176   : > { %v281_v35 = vpop.eup %280 }
 0x177   : > { %v197_v36 = vmul.f32 %v281_v35, %v170_v32 }
 0x179   : > { %198 = vst [vmem:[%s138_s21] sm:$0x7] %v197_v36 }
 0x17a PF: > { %s12_s9 = sadd.s32 1, %s288_s9  }
 0x17b   : > { %p9_p4 = scmp.ge.s32.totalorder %s12_s9, 4  }
 0x17d   :  { %11 = sbr.rel (!%p9_p4) target bundleno = 1 (0x1), region = 58 }

// kernel: _lambda_.4
= control target key start
LH: loop header
LB: loop body
LE: loop exit
PB: predicated region body
PF: predicated region fallthrough
CT: control target
= control target key end

     0   :  { %v45_v0 = vmov 0.0   ;;  %s84_s3 = inlined_call_operand.vmem [shape: f32[1,128], index: 3, kind: output, shape index: {}]   ;;  %s85_s0 = inlined_call_operand.vmem [shape: f32[8,128], index: 0, kind: input, shape index: {}]   ;;  %s86_s1 = inlined_call_operand.vmem [shape: f32[8,128], index: 1, kind: input, shape index: {}]   ;;  %s87_s2 = inlined_call_operand.vmem [shape: f32[8,128], index: 2, kind: input, shape index: {}]  }
   0x1   :  { %18 = vst [vmem:[%s84_s3] sm:$0x1] %v45_v0  ;;  %v19_v1 = vld [vmem:[%s85_s0] sm:$0xff] }
   0x2   :  { %v20_v2 = vld [vmem:[%s86_s1] sm:$0xff] }
   0x3   :  { %v21_v3 = vsub.f32 %v19_v1, %v20_v2  ;;  %v29_v8 = vld [vmem:[%s87_s2] sm:$0xff] }
   0x5   :  { %v22_v4 = vand.u32 2147483647, %v21_v3  ;;  %v24_v5 = vmul.f32 0.5, %v21_v3 }
   0x7   :  { %vm23_vm0 = vcmp.lt.f32.partialorder %v22_v4, 1.0  ;;  %v25_v6 = vmul.f32 %v24_v5, %v21_v3  ;;  %v43_v7 = vadd.f32 -0.5, %v22_v4 }
   0x8   :  { %v28_v16 = vld [vmem:[%s84_s3] sm:$0x1] }
   0x9   :  { %v27_v9 = vsel %vm23_vm0, %v25_v6, %v43_v7 }
   0xa   :  { %v30_v10 = vmul.f32 %v29_v8, %v27_v9 }
   0xc   :  { %v31_v11 = vrot.slane %v30_v10, 4 }
   0xe   :  { %v32_v12 = vadd.f32 %v31_v11, %v30_v10 }
  0x10   :  { %v33_v13 = vrot.slane %v32_v12, 2 }
  0x12   :  { %v34_v14 = vadd.f32 %v33_v13, %v32_v12 }
  0x14   :  { %v35_v15 = vrot.slane %v34_v14, 1 }
  0x16   :  { %v36_v17 = vadd.f32 %v35_v15, %v34_v14 }
  0x18   :  { %v37_v18 = vadd.f32 %v36_v17, %v28_v16 }
  0x1a   :  { %38 = vst [vmem:[%s84_s3] sm:$0x1] %v37_v18 }

</bundles_post_ra>
